<compile_context>
chip_gen: v5e
topology: v5e:2x2
jax: 0.10.0
libtpu: 0.0.40
codegen_flags: <defaults>
</compile_context>

<pallas_src>
import jax
import jax.numpy as jnp
from jax.experimental import pallas as pl
from jax.experimental.pallas import tpu as pltpu

_VMEM_LIMIT = 32 * 1024 * 1024   # safe on v5e/v6e/v7x (v7x scoped default)


def _round_up(x, m):
    return (x + m - 1) // m * m


# ---------------------- tiled batched matmul (bf16 -> f32) ------------------ #

def _mm_kernel(a_ref, b_ref, o_ref, acc_ref):
    """out[g] = a[g] @ b[g], accumulated over the K grid axis."""
    @pl.when(pl.program_id(3) == 0)
    def _init():
        acc_ref[...] = jnp.zeros_like(acc_ref)

    a = a_ref[...]    # (1, tm, tk) bf16
    b = b_ref[...]    # (1, tk, tn) bf16
    acc_ref[...] += jnp.dot(a[0], b[0], preferred_element_type=jnp.float32)

    @pl.when(pl.program_id(3) == pl.num_programs(3) - 1)
    def _store():
        o_ref[...] = acc_ref[...][None]


def batched_matmul_bf16(a, b):
    """(G, M, K) @ (G, K, N) -> padded (G, Mp, Np) float32.

    Pads M/K/N so every block is (8,128)-aligned and the output store is
    lane-dense; callers slice back to (M, N) when they need the exact shape.
    """
    G, M, K = a.shape
    Gb, Kb, N = b.shape
    assert G == Gb and K == Kb

    tm = 256 if M >= 256 else _round_up(M, 16)
    Mp = _round_up(M, tm)
    Np = _round_up(N, 128)
    tn = 256 if Np % 256 == 0 else 128
    Kp = _round_up(K, 128)
    tk = next(t for t in (512, 256, 128) if Kp % t == 0)

    a_p = jnp.pad(a.astype(jnp.bfloat16), ((0, 0), (0, Mp - M), (0, Kp - K)))
    b_p = jnp.pad(b.astype(jnp.bfloat16), ((0, 0), (0, Kp - K), (0, Np - N)))

    grid = (G, Mp // tm, Np // tn, Kp // tk)

    out = pl.pallas_call(
        _mm_kernel,
        out_shape=jax.ShapeDtypeStruct((G, Mp, Np), jnp.float32),
        grid=grid,
        in_specs=[
            pl.BlockSpec((1, tm, tk), lambda g, i, j, k: (g, i, k)),
            pl.BlockSpec((1, tk, tn), lambda g, i, j, k: (g, k, j)),
        ],
        out_specs=pl.BlockSpec((1, tm, tn), lambda g, i, j, k: (g, i, j)),
        scratch_shapes=[pltpu.VMEM((tm, tn), jnp.float32)],
        compiler_params=pltpu.CompilerParams(
            dimension_semantics=("parallel", "parallel", "parallel", "arbitrary"),
            vmem_limit_bytes=_VMEM_LIMIT,
        ),
    )(a_p, b_p)
    return out, (M, N)


# --------------------- tiled training-mode BatchNorm ------------------------ #

def _bn_stats_kernel(x_ref, s_ref, q_ref, s_acc, q_acc):
    @pl.when(pl.program_id(0) == 0)
    def _init():
        s_acc[...] = jnp.zeros_like(s_acc)
        q_acc[...] = jnp.zeros_like(q_acc)

    x = x_ref[...]                                        # (tm, Cp) f32
    s_acc[...] += jnp.sum(x, axis=0, keepdims=True)
    q_acc[...] += jnp.sum(x * x, axis=0, keepdims=True)

    @pl.when(pl.program_id(0) == pl.num_programs(0) - 1)
    def _store():
        s_ref[...] = s_acc[...]
        q_ref[...] = q_acc[...]


def bn_channel_stats(x2d):
    """Per-channel (sum, sum-of-squares) of an (Mp, Cp) f32 tensor (zero rows OK)."""
    Mp, Cp = x2d.shape
    tm = 256 if Mp >= 256 else _round_up(Mp, 8)
    Mp2 = _round_up(Mp, tm)
    if Mp2 != Mp:
        x2d = jnp.pad(x2d, ((0, Mp2 - Mp), (0, 0)))
    return pl.pallas_call(
        _bn_stats_kernel,
        out_shape=(jax.ShapeDtypeStruct((1, Cp), jnp.float32),
                   jax.ShapeDtypeStruct((1, Cp), jnp.float32)),
        grid=(Mp2 // tm,),
        in_specs=[pl.BlockSpec((tm, Cp), lambda i: (i, 0))],
        out_specs=(pl.BlockSpec((1, Cp), lambda i: (0, 0)),
                   pl.BlockSpec((1, Cp), lambda i: (0, 0))),
        scratch_shapes=[pltpu.VMEM((1, Cp), jnp.float32),
                        pltpu.VMEM((1, Cp), jnp.float32)],
        compiler_params=pltpu.CompilerParams(
            dimension_semantics=("arbitrary",),      # sequential reduction
            vmem_limit_bytes=_VMEM_LIMIT,
        ),
    )(x2d)


def _bn_apply_kernel(x_ref, scale_ref, shift_ref, o_ref):
    o_ref[...] = x_ref[...] * scale_ref[...] + shift_ref[...]


def bn_apply(x2d, scale, shift):
    """Elementwise per-channel scale/shift of (Mp, Cp), tiled over rows."""
    Mp, Cp = x2d.shape
    tm = 256 if Mp >= 256 else _round_up(Mp, 8)
    Mp2 = _round_up(Mp, tm)
    pad = Mp2 - Mp
    xp = jnp.pad(x2d, ((0, pad), (0, 0))) if pad else x2d
    out = pl.pallas_call(
        _bn_apply_kernel,
        out_shape=jax.ShapeDtypeStruct((Mp2, Cp), jnp.float32),
        grid=(Mp2 // tm,),
        in_specs=[pl.BlockSpec((tm, Cp), lambda i: (i, 0)),
                  pl.BlockSpec((1, Cp), lambda i: (0, 0)),
                  pl.BlockSpec((1, Cp), lambda i: (0, 0))],
        out_specs=pl.BlockSpec((tm, Cp), lambda i: (i, 0)),
        compiler_params=pltpu.CompilerParams(
            dimension_semantics=("parallel",),
            vmem_limit_bytes=_VMEM_LIMIT,
        ),
    )(xp, scale, shift)
    return out[:Mp] if pad else out


# ------------------------------- JAX glue ----------------------------------- #

def unet_block_innermost(x_nchw, params):
    """Forward of innermost UnetBlock. Input/output in NCHW (PyTorch convention)."""
    w_down = params["w_down"]        # (ni, nf, 4, 4)  Conv2d weight   (out,in,kh,kw)
    w_up = params["w_up"]            # (ni, nf, 4, 4)  ConvTranspose2d (in,out,kh,kw)
    gamma = params["bn_gamma"]       # (nf,)
    beta = params["bn_beta"]         # (nf,)
    eps = 1e-5

    B, Cin, H, W = x_nchw.shape
    ni = w_down.shape[0]
    nf = w_up.shape[1]
    Ho, Wo = H // 2, W // 2

    # TODO(synk): NCHW<->NHWC transposes and the final channel concat are left as
    # XLA ops to preserve the PyTorch NCHW interface of this block.
    x = jnp.transpose(x_nchw, (0, 2, 3, 1))                       # NHWC

    # --- down: LeakyReLU(0.2) on source, Conv2d k4 s2 p1 as a tiled matmul ---
    xa = jnp.where(x >= 0, x, 0.2 * x)                            # act before patches
    xp = jnp.pad(xa, ((0, 0), (1, 1), (1, 1), (0, 0)))
    taps = []
    for kh in range(4):
        for kw in range(4):
            taps.append(xp[:, kh:kh + 2 * Ho:2, kw:kw + 2 * Wo:2, :])
    patches = jnp.stack(taps, axis=3).reshape(B * Ho * Wo, 16 * Cin)
    wd = jnp.transpose(w_down, (2, 3, 1, 0)).reshape(16 * Cin, ni)
    y_pad, (M_d, _) = batched_matmul_bf16(patches[None], wd[None])
    y = y_pad[0, :M_d, :ni].reshape(B, Ho, Wo, ni)

    # --- up: ReLU on source, ConvTranspose2d k4 s2 p1 via 4-phase 2x2 convs ---
    #   out[2i+py, 2j+px] = sum_{t,s in {0,1}} ypad[i+py+t, j+px+s] @ W[kh(py,t), kw(px,s)]
    #   with kh/kw tap order [3,1] for parity 0 and [2,0] for parity 1.
    ya = jnp.maximum(y, 0.0)
    ypad = jnp.pad(ya, ((0, 0), (1, 1), (1, 1), (0, 0)))
    a_list, b_list = [], []
    for py in range(2):
        for px in range(2):
            ph_taps = []
            for t in range(2):
                for s in range(2):
                    ph_taps.append(ypad[:, py + t:py + t + Ho, px + s:px + s + Wo, :])
            a_list.append(jnp.stack(ph_taps, axis=3).reshape(B * Ho * Wo, 4 * ni))
            kh_idx = [3, 1] if py == 0 else [2, 0]
            kw_idx = [3, 1] if px == 0 else [2, 0]
            wsub = w_up[:, :, kh_idx, :][:, :, :, kw_idx]          # (ni, nf, 2, 2)
            b_list.append(jnp.transpose(wsub, (2, 3, 0, 1)).reshape(4 * ni, nf))
    a_up = jnp.stack(a_list, axis=0)                               # (4, M, 4*ni)
    b_up = jnp.stack(b_list, axis=0)                               # (4, 4*ni, nf)
    z_pad, (M_u, _) = batched_matmul_bf16(a_up, b_up)              # (4, Mp, Np) f32
    _, Mp_u, Np_u = z_pad.shape

    # --- BatchNorm2d(nf), training-mode batch statistics (tiled kernels) ---
    # Padded rows/channels are zero, so they do not perturb sum / sum-of-squares.
    z2d = z_pad.reshape(4 * Mp_u, Np_u)
    s, q = bn_channel_stats(z2d)
    count = 4.0 * M_u                                              # = B * H * W
    mean = s[0] / count
    var = jnp.maximum(q[0] / count - mean * mean, 0.0)             # biased (PyTorch train)
    gamma_p = jnp.pad(gamma, (0, Np_u - nf))
    beta_p = jnp.pad(beta, (0, Np_u - nf))
    scale_v = gamma_p * jax.lax.rsqrt(var + eps)
    shift_v = beta_p - mean * scale_v
    zn = bn_apply(z2d, scale_v.reshape(1, Np_u), shift_v.reshape(1, Np_u))
    zn = zn.reshape(4, Mp_u, Np_u)[:, :M_u, :nf]
    # TODO(synk): running_mean/running_var buffer updates (nn.BatchNorm2d state) are
    # not modeled; forward output matches PyTorch training mode.

    # --- interleave the 4 output parities -> (B, H, W, nf) ---
    z6 = zn.reshape(2, 2, B, Ho, Wo, nf)
    z = jnp.transpose(z6, (2, 3, 0, 4, 1, 5)).reshape(B, 2 * Ho, 2 * Wo, nf)
    z_nchw = jnp.transpose(z, (0, 3, 1, 2))

    # --- skip connection: cat([x, model(x)], dim=1) ---
    return jnp.concatenate([x_nchw, z_nchw], axis=1)


# --------------------------------- main -------------------------------------- #

if __name__ == "__main__":
    key = jax.random.PRNGKey(0)
    k_x, k_wd, k_wu, k_g = jax.random.split(key, 4)

    # small instantiation of UnetBlock(nf, ni, innermost=True)
    B, nf, ni, H, W = 2, 4, 8, 16, 16

    x = jax.random.normal(k_x, (B, nf, H, W), jnp.float32)

    params = {
        # init='norm' style: N(0, 0.02) conv weights; BN gamma ~ N(1, 0.02), beta = 0
        "w_down": 0.02 * jax.random.normal(k_wd, (ni, nf, 4, 4), jnp.float32),
        "w_up": 0.02 * jax.random.normal(k_wu, (ni, nf, 4, 4), jnp.float32),
        "bn_gamma": 1.0 + 0.02 * jax.random.normal(k_g, (nf,), jnp.float32),
        "bn_beta": jnp.zeros((nf,), jnp.float32),
    }

    out = jax.jit(unet_block_innermost)(x, params)
    jax.block_until_ready(out)
    assert out.shape == (B, 2 * nf, H, W), out.shape
    print("KERNEL_OK")
</pallas_src>

<mosaic_0001>
module attributes {stable_mosaic.version = 11 : i64} {
  func.func @_mm_kernel(%arg0: i32, %arg1: i32, %arg2: i32, %arg3: i32, %arg4: memref<1x128x128xbf16, #tpu.memory_space<vmem>>, %arg5: memref<1x128x128xbf16, #tpu.memory_space<vmem>>, %arg6: memref<1x128x128xf32, #tpu.memory_space<vmem>>, %arg7: memref<128x128xf32, #tpu.memory_space<vmem>>) attributes {dimension_semantics = [#tpu.dimension_semantics<parallel>, #tpu.dimension_semantics<parallel>, #tpu.dimension_semantics<parallel>, #tpu.dimension_semantics<arbitrary>], iteration_bounds = array<i64: 1, 1, 1, 1>, scalar_prefetch = 0 : i64, scratch_operands = 1 : i64, tpu.core_type = #tpu.core_type<tc>, window_params = [{transform_indices = @transform_0, window_bounds = array<i64: 1, 128, 128>}, {transform_indices = @transform_1, window_bounds = array<i64: 1, 128, 128>}, {transform_indices = @transform_2, window_bounds = array<i64: 1, 128, 128>}]} {
    %c0_i32 = arith.constant 0 : i32
    %0 = arith.cmpi eq, %arg3, %c0_i32 : i32
    %1 = arith.extui %0 : i1 to i32
    %c0_i32_0 = arith.constant 0 : i32
    %2 = arith.cmpi ne, %1, %c0_i32_0 : i32
    scf.if %2 {
      %cst_12 = arith.constant 0.000000e+00 : f32
      %14 = vector.broadcast %cst_12 : f32 to vector<128x128xf32>
      %c0_13 = arith.constant 0 : index
      %c0_14 = arith.constant 0 : index
      %15 = vector.load %arg7[%c0_13, %c0_14] : memref<128x128xf32, #tpu.memory_space<vmem>>, vector<128x128xf32>
      tpu.vector_store %arg7[%c0_13, %c0_14], %14 {strides = array<i32>} : memref<128x128xf32, #tpu.memory_space<vmem>>, vector<128x128xf32>,
    } else {
    }
    %c0 = arith.constant 0 : index
    %c0_1 = arith.constant 0 : index
    %c0_2 = arith.constant 0 : index
    %3 = vector.load %arg4[%c0, %c0_1, %c0_2] : memref<1x128x128xbf16, #tpu.memory_space<vmem>>, vector<1x128x128xbf16>
    %c0_3 = arith.constant 0 : index
    %c0_4 = arith.constant 0 : index
    %c0_5 = arith.constant 0 : index
    %4 = vector.load %arg5[%c0_3, %c0_4, %c0_5] : memref<1x128x128xbf16, #tpu.memory_space<vmem>>, vector<1x128x128xbf16>
    %c0_6 = arith.constant 0 : index
    %c0_7 = arith.constant 0 : index
    %5 = vector.load %arg7[%c0_6, %c0_7] : memref<128x128xf32, #tpu.memory_space<vmem>>, vector<128x128xf32>
    %6 = vector.shape_cast %3 : vector<1x128x128xbf16> to vector<128x128xbf16>
    %7 = vector.shape_cast %4 : vector<1x128x128xbf16> to vector<128x128xbf16>
    %cst = arith.constant dense<0.000000e+00> : vector<128x128xf32>
    %8 = tpu.matmul %6, %7, %cst {dimension_numbers = #tpu.dot_dimension_numbers<[1], [0], [0], [1], [0, 0, 1, 1], [], []>} : vector<128x128xbf16>, vector<128x128xbf16>, vector<128x128xf32> -> vector<128x128xf32>
    %9 = arith.addf %5, %8 : vector<128x128xf32>
    %c0_8 = arith.constant 0 : index
    %c0_9 = arith.constant 0 : index
    %10 = vector.load %arg7[%c0_8, %c0_9] : memref<128x128xf32, #tpu.memory_space<vmem>>, vector<128x128xf32>
    tpu.vector_store %arg7[%c0_8, %c0_9], %9 {strides = array<i32>} : memref<128x128xf32, #tpu.memory_space<vmem>>, vector<128x128xf32>,
    %c0_i32_10 = arith.constant 0 : i32
    %11 = arith.cmpi eq, %arg3, %c0_i32_10 : i32
    %12 = arith.extui %11 : i1 to i32
    %c0_i32_11 = arith.constant 0 : i32
    %13 = arith.cmpi ne, %12, %c0_i32_11 : i32
    scf.if %13 {
      %c0_12 = arith.constant 0 : index
      %c0_13 = arith.constant 0 : index
      %14 = vector.load %arg7[%c0_12, %c0_13] : memref<128x128xf32, #tpu.memory_space<vmem>>, vector<128x128xf32>
      %15 = vector.shape_cast %14 : vector<128x128xf32> to vector<1x128x128xf32>
      %c0_14 = arith.constant 0 : index
      %c0_15 = arith.constant 0 : index
      %c0_16 = arith.constant 0 : index
      %16 = vector.load %arg6[%c0_14, %c0_15, %c0_16] : memref<1x128x128xf32, #tpu.memory_space<vmem>>, vector<1x128x128xf32>
      tpu.vector_store %arg6[%c0_14, %c0_15, %c0_16], %15 {strides = array<i32>} : memref<1x128x128xf32, #tpu.memory_space<vmem>>, vector<1x128x128xf32>,
    } else {
    }
    return
  }
  func.func @transform_0(%arg0: i32, %arg1: i32, %arg2: i32, %arg3: i32) -> (i32, i32, i32) {
    %c0_i32 = arith.constant 0 : i32
    return %arg0, %arg1, %arg3 : i32, i32, i32
  }
  func.func @transform_1(%arg0: i32, %arg1: i32, %arg2: i32, %arg3: i32) -> (i32, i32, i32) {
    %c0_i32 = arith.constant 0 : i32
    return %arg0, %arg3, %arg2 : i32, i32, i32
  }
  func.func @transform_2(%arg0: i32, %arg1: i32, %arg2: i32, %arg3: i32) -> (i32, i32, i32) {
    %c0_i32 = arith.constant 0 : i32
    return %arg0, %arg1, %arg2 : i32, i32, i32
  }
}

module attributes {stable_mosaic.version = 11 : i64} {
  func.func @_bn_apply_kernel(%arg0: i32, %arg1: memref<256x128xf32, #tpu.memory_space<vmem>>, %arg2: memref<1x128xf32, #tpu.memory_space<vmem>>, %arg3: memref<1x128xf32, #tpu.memory_space<vmem>>, %arg4: memref<256x128xf32, #tpu.memory_space<vmem>>) attributes {dimension_semantics = [#tpu.dimension_semantics<parallel>], iteration_bounds = array<i64: 2>, scalar_prefetch = 0 : i64, scratch_operands = 0 : i64, tpu.core_type = #tpu.core_type<tc>, window_params = [{transform_indices = @transform_0, window_bounds = array<i64: 256, 128>}, {pipeline_mode = #tpu.pipeline_mode<synchronous>, transform_indices = @transform_1, window_bounds = array<i64: 1, 128>}, {pipeline_mode = #tpu.pipeline_mode<synchronous>, transform_indices = @transform_2, window_bounds = array<i64: 1, 128>}, {transform_indices = @transform_3, window_bounds = array<i64: 256, 128>}]} {
    %c0 = arith.constant 0 : index
    %c0_0 = arith.constant 0 : index
    %0 = vector.load %arg1[%c0, %c0_0] : memref<256x128xf32, #tpu.memory_space<vmem>>, vector<256x128xf32>
    %c0_1 = arith.constant 0 : index
    %c0_2 = arith.constant 0 : index
    %1 = vector.load %arg2[%c0_1, %c0_2] : memref<1x128xf32, #tpu.memory_space<vmem>>, vector<1x128xf32>
    %2 = vector.broadcast %1 : vector<1x128xf32> to vector<256x128xf32>
    %3 = arith.mulf %0, %2 : vector<256x128xf32>
    %c0_3 = arith.constant 0 : index
    %c0_4 = arith.constant 0 : index
    %4 = vector.load %arg3[%c0_3, %c0_4] : memref<1x128xf32, #tpu.memory_space<vmem>>, vector<1x128xf32>
    %5 = vector.broadcast %4 : vector<1x128xf32> to vector<256x128xf32>
    %6 = arith.addf %3, %5 : vector<256x128xf32>
    %c0_5 = arith.constant 0 : index
    %c0_6 = arith.constant 0 : index
    %7 = vector.load %arg4[%c0_5, %c0_6] : memref<256x128xf32, #tpu.memory_space<vmem>>, vector<256x128xf32>
    tpu.vector_store %arg4[%c0_5, %c0_6], %6 {strides = array<i32>} : memref<256x128xf32, #tpu.memory_space<vmem>>, vector<256x128xf32>,
    return
  }
  func.func @transform_0(%arg0: i32) -> (i32, i32) {
    %c0_i32 = arith.constant 0 : i32
    %c0_i32_0 = arith.constant 0 : i32
    return %arg0, %c0_i32 : i32, i32
  }
  func.func @transform_1(%arg0: i32) -> (i32, i32) {
    %c0_i32 = arith.constant 0 : i32
    %c0_i32_0 = arith.constant 0 : i32
    %c0_i32_1 = arith.constant 0 : i32
    return %c0_i32, %c0_i32_0 : i32, i32
  }
  func.func @transform_2(%arg0: i32) -> (i32, i32) {
    %c0_i32 = arith.constant 0 : i32
    %c0_i32_0 = arith.constant 0 : i32
    %c0_i32_1 = arith.constant 0 : i32
    return %c0_i32, %c0_i32_0 : i32, i32
  }
  func.func @transform_3(%arg0: i32) -> (i32, i32) {
    %c0_i32 = arith.constant 0 : i32
    %c0_i32_0 = arith.constant 0 : i32
    return %arg0, %c0_i32 : i32, i32
  }
}

module attributes {stable_mosaic.version = 11 : i64} {
  func.func @_bn_stats_kernel(%arg0: i32, %arg1: memref<256x128xf32, #tpu.memory_space<vmem>>, %arg2: memref<1x128xf32, #tpu.memory_space<vmem>>, %arg3: memref<1x128xf32, #tpu.memory_space<vmem>>, %arg4: memref<1x128xf32, #tpu.memory_space<vmem>>, %arg5: memref<1x128xf32, #tpu.memory_space<vmem>>) attributes {dimension_semantics = [#tpu.dimension_semantics<arbitrary>], iteration_bounds = array<i64: 2>, scalar_prefetch = 0 : i64, scratch_operands = 2 : i64, tpu.core_type = #tpu.core_type<tc>, window_params = [{transform_indices = @transform_0, window_bounds = array<i64: 256, 128>}, {pipeline_mode = #tpu.pipeline_mode<synchronous>, transform_indices = @transform_1, window_bounds = array<i64: 1, 128>}, {pipeline_mode = #tpu.pipeline_mode<synchronous>, transform_indices = @transform_2, window_bounds = array<i64: 1, 128>}]} {
    %c0_i32 = arith.constant 0 : i32
    %0 = arith.cmpi eq, %arg0, %c0_i32 : i32
    %1 = arith.extui %0 : i1 to i32
    %c0_i32_0 = arith.constant 0 : i32
    %2 = arith.cmpi ne, %1, %c0_i32_0 : i32
    scf.if %2 {
      %cst_12 = arith.constant 0.000000e+00 : f32
      %18 = vector.broadcast %cst_12 : f32 to vector<1x128xf32>
      %c0_13 = arith.constant 0 : index
      %c0_14 = arith.constant 0 : index
      %19 = vector.load %arg4[%c0_13, %c0_14] : memref<1x128xf32, #tpu.memory_space<vmem>>, vector<1x128xf32>
      tpu.vector_store %arg4[%c0_13, %c0_14], %18 {strides = array<i32>} : memref<1x128xf32, #tpu.memory_space<vmem>>, vector<1x128xf32>,
      %cst_15 = arith.constant 0.000000e+00 : f32
      %20 = vector.broadcast %cst_15 : f32 to vector<1x128xf32>
      %c0_16 = arith.constant 0 : index
      %c0_17 = arith.constant 0 : index
      %21 = vector.load %arg5[%c0_16, %c0_17] : memref<1x128xf32, #tpu.memory_space<vmem>>, vector<1x128xf32>
      tpu.vector_store %arg5[%c0_16, %c0_17], %20 {strides = array<i32>} : memref<1x128xf32, #tpu.memory_space<vmem>>, vector<1x128xf32>,
    } else {
    }
    %c0 = arith.constant 0 : index
    %c0_1 = arith.constant 0 : index
    %3 = vector.load %arg1[%c0, %c0_1] : memref<256x128xf32, #tpu.memory_space<vmem>>, vector<256x128xf32>
    %c0_2 = arith.constant 0 : index
    %c0_3 = arith.constant 0 : index
    %4 = vector.load %arg4[%c0_2, %c0_3] : memref<1x128xf32, #tpu.memory_space<vmem>>, vector<1x128xf32>
    %cst = arith.constant dense<0.000000e+00> : vector<128xf32>
    %5 = vector.multi_reduction <add>, %3, %cst [0] : vector<256x128xf32> to vector<128xf32>
    %6 = vector.shape_cast %5 : vector<128xf32> to vector<1x128xf32>
    %7 = arith.addf %4, %6 : vector<1x128xf32>
    %c0_4 = arith.constant 0 : index
    %c0_5 = arith.constant 0 : index
    %8 = vector.load %arg4[%c0_4, %c0_5] : memref<1x128xf32, #tpu.memory_space<vmem>>, vector<1x128xf32>
    tpu.vector_store %arg4[%c0_4, %c0_5], %7 {strides = array<i32>} : memref<1x128xf32, #tpu.memory_space<vmem>>, vector<1x128xf32>,
    %c0_6 = arith.constant 0 : index
    %c0_7 = arith.constant 0 : index
    %9 = vector.load %arg5[%c0_6, %c0_7] : memref<1x128xf32, #tpu.memory_space<vmem>>, vector<1x128xf32>
    %10 = arith.mulf %3, %3 : vector<256x128xf32>
    %cst_8 = arith.constant dense<0.000000e+00> : vector<128xf32>
    %11 = vector.multi_reduction <add>, %10, %cst_8 [0] : vector<256x128xf32> to vector<128xf32>
    %12 = vector.shape_cast %11 : vector<128xf32> to vector<1x128xf32>
    %13 = arith.addf %9, %12 : vector<1x128xf32>
    %c0_9 = arith.constant 0 : index
    %c0_10 = arith.constant 0 : index
    %14 = vector.load %arg5[%c0_9, %c0_10] : memref<1x128xf32, #tpu.memory_space<vmem>>, vector<1x128xf32>
    tpu.vector_store %arg5[%c0_9, %c0_10], %13 {strides = array<i32>} : memref<1x128xf32, #tpu.memory_space<vmem>>, vector<1x128xf32>,
    %c1_i32 = arith.constant 1 : i32
    %15 = arith.cmpi eq, %arg0, %c1_i32 : i32
    %16 = arith.extui %15 : i1 to i32
    %c0_i32_11 = arith.constant 0 : i32
    %17 = arith.cmpi ne, %16, %c0_i32_11 : i32
    scf.if %17 {
      %c0_12 = arith.constant 0 : index
      %c0_13 = arith.constant 0 : index
      %18 = vector.load %arg4[%c0_12, %c0_13] : memref<1x128xf32, #tpu.memory_space<vmem>>, vector<1x128xf32>
      %c0_14 = arith.constant 0 : index
      %c0_15 = arith.constant 0 : index
      %19 = vector.load %arg2[%c0_14, %c0_15] : memref<1x128xf32, #tpu.memory_space<vmem>>, vector<1x128xf32>
      tpu.vector_store %arg2[%c0_14, %c0_15], %18 {strides = array<i32>} : memref<1x128xf32, #tpu.memory_space<vmem>>, vector<1x128xf32>,
      %c0_16 = arith.constant 0 : index
      %c0_17 = arith.constant 0 : index
      %20 = vector.load %arg5[%c0_16, %c0_17] : memref<1x128xf32, #tpu.memory_space<vmem>>, vector<1x128xf32>
      %c0_18 = arith.constant 0 : index
      %c0_19 = arith.constant 0 : index
      %21 = vector.load %arg3[%c0_18, %c0_19] : memref<1x128xf32, #tpu.memory_space<vmem>>, vector<1x128xf32>
      tpu.vector_store %arg3[%c0_18, %c0_19], %20 {strides = array<i32>} : memref<1x128xf32, #tpu.memory_space<vmem>>, vector<1x128xf32>,
    } else {
    }
    return
  }
  func.func @transform_0(%arg0: i32) -> (i32, i32) {
    %c0_i32 = arith.constant 0 : i32
    %c0_i32_0 = arith.constant 0 : i32
    return %arg0, %c0_i32 : i32, i32
  }
  func.func @transform_1(%arg0: i32) -> (i32, i32) {
    %c0_i32 = arith.constant 0 : i32
    %c0_i32_0 = arith.constant 0 : i32
    %c0_i32_1 = arith.constant 0 : i32
    return %c0_i32, %c0_i32_0 : i32, i32
  }
  func.func @transform_2(%arg0: i32) -> (i32, i32) {
    %c0_i32 = arith.constant 0 : i32
    %c0_i32_0 = arith.constant 0 : i32
    %c0_i32_1 = arith.constant 0 : i32
    return %c0_i32, %c0_i32_0 : i32, i32
  }
}

module attributes {stable_mosaic.version = 11 : i64} {
  func.func @_mm_kernel(%arg0: i32, %arg1: i32, %arg2: i32, %arg3: i32, %arg4: memref<1x128x128xbf16, #tpu.memory_space<vmem>>, %arg5: memref<1x128x128xbf16, #tpu.memory_space<vmem>>, %arg6: memref<1x128x128xf32, #tpu.memory_space<vmem>>, %arg7: memref<128x128xf32, #tpu.memory_space<vmem>>) attributes {dimension_semantics = [#tpu.dimension_semantics<parallel>, #tpu.dimension_semantics<parallel>, #tpu.dimension_semantics<parallel>, #tpu.dimension_semantics<arbitrary>], iteration_bounds = array<i64: 4, 1, 1, 1>, scalar_prefetch = 0 : i64, scratch_operands = 1 : i64, tpu.core_type = #tpu.core_type<tc>, window_params = [{transform_indices = @transform_0, window_bounds = array<i64: 1, 128, 128>}, {transform_indices = @transform_1, window_bounds = array<i64: 1, 128, 128>}, {transform_indices = @transform_2, window_bounds = array<i64: 1, 128, 128>}]} {
    %c0_i32 = arith.constant 0 : i32
    %0 = arith.cmpi eq, %arg3, %c0_i32 : i32
    %1 = arith.extui %0 : i1 to i32
    %c0_i32_0 = arith.constant 0 : i32
    %2 = arith.cmpi ne, %1, %c0_i32_0 : i32
    scf.if %2 {
      %cst_12 = arith.constant 0.000000e+00 : f32
      %14 = vector.broadcast %cst_12 : f32 to vector<128x128xf32>
      %c0_13 = arith.constant 0 : index
      %c0_14 = arith.constant 0 : index
      %15 = vector.load %arg7[%c0_13, %c0_14] : memref<128x128xf32, #tpu.memory_space<vmem>>, vector<128x128xf32>
      tpu.vector_store %arg7[%c0_13, %c0_14], %14 {strides = array<i32>} : memref<128x128xf32, #tpu.memory_space<vmem>>, vector<128x128xf32>,
    } else {
    }
    %c0 = arith.constant 0 : index
    %c0_1 = arith.constant 0 : index
    %c0_2 = arith.constant 0 : index
    %3 = vector.load %arg4[%c0, %c0_1, %c0_2] : memref<1x128x128xbf16, #tpu.memory_space<vmem>>, vector<1x128x128xbf16>
    %c0_3 = arith.constant 0 : index
    %c0_4 = arith.constant 0 : index
    %c0_5 = arith.constant 0 : index
    %4 = vector.load %arg5[%c0_3, %c0_4, %c0_5] : memref<1x128x128xbf16, #tpu.memory_space<vmem>>, vector<1x128x128xbf16>
    %c0_6 = arith.constant 0 : index
    %c0_7 = arith.constant 0 : index
    %5 = vector.load %arg7[%c0_6, %c0_7] : memref<128x128xf32, #tpu.memory_space<vmem>>, vector<128x128xf32>
    %6 = vector.shape_cast %3 : vector<1x128x128xbf16> to vector<128x128xbf16>
    %7 = vector.shape_cast %4 : vector<1x128x128xbf16> to vector<128x128xbf16>
    %cst = arith.constant dense<0.000000e+00> : vector<128x128xf32>
    %8 = tpu.matmul %6, %7, %cst {dimension_numbers = #tpu.dot_dimension_numbers<[1], [0], [0], [1], [0, 0, 1, 1], [], []>} : vector<128x128xbf16>, vector<128x128xbf16>, vector<128x128xf32> -> vector<128x128xf32>
    %9 = arith.addf %5, %8 : vector<128x128xf32>
    %c0_8 = arith.constant 0 : index
    %c0_9 = arith.constant 0 : index
    %10 = vector.load %arg7[%c0_8, %c0_9] : memref<128x128xf32, #tpu.memory_space<vmem>>, vector<128x128xf32>
    tpu.vector_store %arg7[%c0_8, %c0_9], %9 {strides = array<i32>} : memref<128x128xf32, #tpu.memory_space<vmem>>, vector<128x128xf32>,
    %c0_i32_10 = arith.constant 0 : i32
    %11 = arith.cmpi eq, %arg3, %c0_i32_10 : i32
    %12 = arith.extui %11 : i1 to i32
    %c0_i32_11 = arith.constant 0 : i32
    %13 = arith.cmpi ne, %12, %c0_i32_11 : i32
    scf.if %13 {
      %c0_12 = arith.constant 0 : index
      %c0_13 = arith.constant 0 : index
      %14 = vector.load %arg7[%c0_12, %c0_13] : memref<128x128xf32, #tpu.memory_space<vmem>>, vector<128x128xf32>
      %15 = vector.shape_cast %14 : vector<128x128xf32> to vector<1x128x128xf32>
      %c0_14 = arith.constant 0 : index
      %c0_15 = arith.constant 0 : index
      %c0_16 = arith.constant 0 : index
      %16 = vector.load %arg6[%c0_14, %c0_15, %c0_16] : memref<1x128x128xf32, #tpu.memory_space<vmem>>, vector<1x128x128xf32>
      tpu.vector_store %arg6[%c0_14, %c0_15, %c0_16], %15 {strides = array<i32>} : memref<1x128x128xf32, #tpu.memory_space<vmem>>, vector<1x128x128xf32>,
    } else {
    }
    return
  }
  func.func @transform_0(%arg0: i32, %arg1: i32, %arg2: i32, %arg3: i32) -> (i32, i32, i32) {
    %c0_i32 = arith.constant 0 : i32
    return %arg0, %arg1, %arg3 : i32, i32, i32
  }
  func.func @transform_1(%arg0: i32, %arg1: i32, %arg2: i32, %arg3: i32) -> (i32, i32, i32) {
    %c0_i32 = arith.constant 0 : i32
    return %arg0, %arg3, %arg2 : i32, i32, i32
  }
  func.func @transform_2(%arg0: i32, %arg1: i32, %arg2: i32, %arg3: i32) -> (i32, i32, i32) {
    %c0_i32 = arith.constant 0 : i32
    return %arg0, %arg1, %arg2 : i32, i32, i32
  }
}

</mosaic_0001>

<bundles_post_ra>
// kernel: unet_block_innermost.4
= control target key start
LH: loop header
LB: loop body
LE: loop exit
PB: predicated region body
PF: predicated region fallthrough
CT: control target
= control target key end

     0   :  { %s510_s1 = inlined_call_operand.vmem [shape: bf16[1,128,128], index: 1, kind: input, shape index: {}]   ;;  %s511_s0 = inlined_call_operand.vmem [shape: bf16[1,128,128], index: 0, kind: input, shape index: {}]   ;;  %s512_s2 = inlined_call_operand.vmem [shape: f32[1,128,128], index: 2, kind: output, shape index: {}]  }
   0x1   :  { %v374_v0 = vld [vmem:[%s510_s1 + $0x38] sm:$0xff]  ;;  %v373_v1 = vld [vmem:[%s510_s1 + $0x30] sm:$0xff]  ;;  %v372_v2 = vld [vmem:[%s510_s1 + $0x28] sm:$0xff] }
   0x2   :  { %175 = vmatpush.bf16.msra.mxu0 %v374_v0  ;;  %375 = vmatpush.bf16.msra.mxu1 %v374_v0  ;;  %v371_v3 = vld [vmem:[%s510_s1 + $0x20] sm:$0xff]  ;;  %v370_v4 = vld [vmem:[%s510_s1 + $0x18] sm:$0xff]  ;;  %v369_v5 = vld [vmem:[%s510_s1 + $0x10] sm:$0xff] }
   0x3   :  { %376 = vmatpush.bf16.msra.mxu2 %v374_v0  ;;  %377 = vmatpush.bf16.msra.mxu3 %v374_v0  ;;  %v368_v6 = vld [vmem:[%s510_s1 + $0x8] sm:$0xff]  ;;  %v367_v7 = vld [vmem:[%s510_s1] sm:$0xff]  ;;  %v361_v9 = vld [vmem:[%s511_s0 + $0x10] sm:$0xff] }
   0x4   :  { %v359_v8 = vld [vmem:[%s511_s0] sm:$0xff]  ;;  %v365_v11 = vld [vmem:[%s511_s0 + $0x30] sm:$0xff]  ;;  %v360_v12 = vld [vmem:[%s511_s0 + $0x8] sm:$0xff] }
   0x5   :  { %v363_v10 = vld [vmem:[%s511_s0 + $0x20] sm:$0xff]  ;;  %v362_v13 = vld [vmem:[%s511_s0 + $0x18] sm:$0xff]  ;;  %v364_v14 = vld [vmem:[%s511_s0 + $0x28] sm:$0xff] }
   0x6   :  { %176 = vmatpush.bf16.msra.mxu0 %v373_v1  ;;  %378 = vmatpush.bf16.msra.mxu1 %v373_v1  ;;  %v366_v15 = vld [vmem:[%s511_s0 + $0x38] sm:$0xff] }
   0x7   :  { %379 = vmatpush.bf16.msra.mxu2 %v373_v1  ;;  %380 = vmatpush.bf16.msra.mxu3 %v373_v1 }
   0xa   :  { %177 = vmatpush.bf16.msra.mxu0 %v372_v2  ;;  %381 = vmatpush.bf16.msra.mxu1 %v372_v2 }
   0xb   :  { %382 = vmatpush.bf16.msra.mxu2 %v372_v2  ;;  %383 = vmatpush.bf16.msra.mxu3 %v372_v2 }
   0xe   :  { %178 = vmatpush.bf16.msra.mxu0 %v371_v3  ;;  %384 = vmatpush.bf16.msra.mxu1 %v371_v3 }
   0xf   :  { %385 = vmatpush.bf16.msra.mxu2 %v371_v3  ;;  %386 = vmatpush.bf16.msra.mxu3 %v371_v3 }
  0x12   :  { %179 = vmatpush.bf16.msra.mxu0 %v370_v4  ;;  %387 = vmatpush.bf16.msra.mxu1 %v370_v4 }
  0x13   :  { %388 = vmatpush.bf16.msra.mxu2 %v370_v4  ;;  %389 = vmatpush.bf16.msra.mxu3 %v370_v4 }
  0x16   :  { %180 = vmatpush.bf16.msra.mxu0 %v369_v5  ;;  %390 = vmatpush.bf16.msra.mxu1 %v369_v5 }
  0x17   :  { %391 = vmatpush.bf16.msra.mxu2 %v369_v5  ;;  %392 = vmatpush.bf16.msra.mxu3 %v369_v5 }
  0x1a   :  { %181 = vmatpush.bf16.msra.mxu0 %v368_v6  ;;  %393 = vmatpush.bf16.msra.mxu1 %v368_v6 }
  0x1b   :  { %394 = vmatpush.bf16.msra.mxu2 %v368_v6  ;;  %395 = vmatpush.bf16.msra.mxu3 %v368_v6 }
  0x1e   :  { %182 = vmatpush.bf16.msra.mxu0 %v367_v7  ;;  %396 = vmatpush.bf16.msra.mxu1 %v367_v7 }
  0x1f   :  { %397 = vmatpush.bf16.msra.mxu2 %v367_v7  ;;  %398 = vmatpush.bf16.msra.mxu3 %v367_v7 }
  0x21   :  { %183 = vmatmul.bf16.vlgmr.msra.gmra.mxu0 %v359_v8  ;;  %193 = vmatmul.bf16.vlgmr.msra.gmra.mxu1 %v361_v9 }
  0x22   :  { %203 = vmatmul.bf16.vlgmr.msra.gmra.mxu2 %v363_v10  ;;  %213 = vmatmul.bf16.vlgmr.msra.gmra.mxu3 %v365_v11 }
  0x31   :  { %188 = vmatmul.bf16.gmra.mxu0 %v360_v12  ;;  %198 = vmatmul.bf16.gmra.mxu1 %v362_v13 }
  0x32   :  { %208 = vmatmul.bf16.gmra.mxu2 %v364_v14  ;;  %218 = vmatmul.bf16.gmra.mxu3 %v366_v15 }
  0x9e   :  { %v184_v16 = vpop.f32.mrf.mxu0  ;;  %v194_v17 = vpop.f32.mrf.mxu1 }
  0x9f   :  { %275 = vst [vmem:[%s512_s2] sm:$0xff] %v184_v16 }
  0xa0   :  { %279 = vst [vmem:[%s512_s2 + $0x20] sm:$0xff] %v194_v17 }
  0xa5   :  { %v204_v18 = vpop.f32.mrf.mxu2  ;;  %v214_v19 = vpop.f32.mrf.mxu3 }
  0xa6   :  { %283 = vst [vmem:[%s512_s2 + $0x40] sm:$0xff] %v204_v18  ;;  %v186_v20 = vpop.f32.mrf.mxu0  ;;  %v196_v21 = vpop.f32.mrf.mxu1 }
  0xa7   :  { %287 = vst [vmem:[%s512_s2 + $0x60] sm:$0xff] %v214_v19 }
  0xa8   :  { %276 = vst [vmem:[%s512_s2 + $0x8] sm:$0xff] %v186_v20 }
  0xa9   :  { %280 = vst [vmem:[%s512_s2 + $0x28] sm:$0xff] %v196_v21 }
  0xad   :  { %v206_v22 = vpop.f32.mrf.mxu2  ;;  %v216_v23 = vpop.f32.mrf.mxu3 }
  0xae   :  { %284 = vst [vmem:[%s512_s2 + $0x48] sm:$0xff] %v206_v22  ;;  %v189_v24 = vpop.f32.mrf.mxu0  ;;  %v199_v25 = vpop.f32.mrf.mxu1 }
  0xaf   :  { %288 = vst [vmem:[%s512_s2 + $0x68] sm:$0xff] %v216_v23 }
  0xb0   :  { %277 = vst [vmem:[%s512_s2 + $0x10] sm:$0xff] %v189_v24 }
  0xb1   :  { %281 = vst [vmem:[%s512_s2 + $0x30] sm:$0xff] %v199_v25 }
  0xb5   :  { %v209_v26 = vpop.f32.mrf.mxu2  ;;  %v219_v27 = vpop.f32.mrf.mxu3 }
  0xb6   :  { %285 = vst [vmem:[%s512_s2 + $0x50] sm:$0xff] %v209_v26  ;;  %v191_v28 = vpop.f32.mrf.mxu0  ;;  %v201_v29 = vpop.f32.mrf.mxu1 }
  0xb7   :  { %289 = vst [vmem:[%s512_s2 + $0x70] sm:$0xff] %v219_v27 }
  0xb8   :  { %278 = vst [vmem:[%s512_s2 + $0x18] sm:$0xff] %v191_v28 }
  0xb9   :  { %282 = vst [vmem:[%s512_s2 + $0x38] sm:$0xff] %v201_v29 }
  0xbd   :  { %v211_v30 = vpop.f32.mrf.mxu2  ;;  %v221_v31 = vpop.f32.mrf.mxu3 }
  0xbe   :  { %286 = vst [vmem:[%s512_s2 + $0x58] sm:$0xff] %v211_v30 }
  0xbf   :  { %290 = vst [vmem:[%s512_s2 + $0x78] sm:$0xff] %v221_v31 }

// kernel: unet_block_innermost.6
= control target key start
LH: loop header
LB: loop body
LE: loop exit
PB: predicated region body
PF: predicated region fallthrough
CT: control target
= control target key end

     0   :  { %s364_s9 = smov 0   ;;  %s423_s0 = inlined_call_operand.vmem [shape: f32[512,128], index: 0, kind: input, shape index: {}]   ;;  %s424_s1 = inlined_call_operand.vmem [shape: f32[1,128], index: 1, kind: output, shape index: {0}]   ;;  %s425_s2 = inlined_call_operand.vmem [shape: f32[1,128], index: 2, kind: output, shape index: {1}]  }
   0x1 LB: > { %s370_s10 = sadd.s32 4294967295, %s346_s9   ;;  %p324_p0 = scmp.ge.s32.totalorder %s346_s9, 1  ;;  %s346_s9 = sphi %s364_s9, %s13_s9  }
   0x2   : > { %p106_p1 = scmp.lt.s32.totalorder %s346_s9, 3 }
   0x4   : > { %p107_p2 = pnand %p324_p0, %p106_p1 }
   0x5   : > { %s325_s11 = sshll.u32 (!%p107_p2), %s370_s10, 5  ;;  %p327_p4 = scmp.ne.s32.totalorder (!%p107_p2), %s370_s10, 0 }
   0x6   : > { %110 = sbr.rel (%p107_p2) target bundleno = 107 (0x6b), region = 24  ;;  %p124_p3 = scmp.lt.s32.totalorder (!%p107_p2), %s325_s11, 63 }
   0xb   : > { %s427_s11 = smov (!%p124_p3, %s325_s11), 63  ;;  %132 = sbr.rel (%p327_p4) target bundleno = 19 (0x13), region = 28 }
   0xc   : > { %s326_s12 = sshll.u32 %s427_s11, 3 }
   0xd   : > { %s378_s15 = scalar_lea.vmem %s423_s0, %s326_s12 }
  0x10   : > { %v348_v0 = vmov 0.0  }
  0x11   : > { %133 = vst [vmem:[#allocation2] sm:$0x1] %v348_v0 }
  0x12   : > { %134 = vst [vmem:[#allocation3] sm:$0x1] %v348_v0 }
  0x13 PF: > { %v135_v1 = vld [vmem:[%s378_s15] sm:$0xff]  ;;  %v136_v2 = vld [vmem:[%s378_s15 + $0x8] sm:$0xff]  ;;  %v137_v3 = vld [vmem:[%s378_s15 + $0x10] sm:$0xff]  ;;  %p328_p5 = scmp.ne.s32.totalorder %s370_s10, 1 }
  0x14   : > { %v138_v4 = vld [vmem:[%s378_s15 + $0x18] sm:$0xff]  ;;  %v168_v5 = vadd.f32 %v136_v2, %v135_v1  ;;  %v208_v6 = vmul.f32 %v135_v1, %v135_v1  ;;  %v209_v7 = vmul.f32 %v136_v2, %v136_v2  ;;  %v210_v8 = vmul.f32 %v137_v3, %v137_v3  ;;  %v139_v9 = vld [vmem:[%s378_s15 + $0x20] sm:$0xff]  ;;  %v140_v13 = vld [vmem:[%s378_s15 + $0x28] sm:$0xff] }
  0x15   : > { %v211_v11 = vmul.f32 %v138_v4, %v138_v4  ;;  %v212_v15 = vmul.f32 %v139_v9, %v139_v9  ;;  %v141_v17 = vld [vmem:[%s378_s15 + $0x30] sm:$0xff]  ;;  %v213_v19 = vmul.f32 %v140_v13, %v140_v13  ;;  %v142_v21 = vld [vmem:[%s378_s15 + $0x38] sm:$0xff]  ;;  %v143_v25 = vld [vmem:[%s378_s15 + $0x40] sm:$0xff] }
  0x16   : > { %v169_v10 = vadd.f32 %v168_v5, %v137_v3  ;;  %v240_v12 = vadd.f32 %v209_v7, %v208_v6  ;;  %v214_v23 = vmul.f32 %v141_v17, %v141_v17  ;;  %v215_v27 = vmul.f32 %v142_v21, %v142_v21  ;;  %v144_v29 = vld [vmem:[%s378_s15 + $0x48] sm:$0xff]  ;;  %v145_v33 = vld [vmem:[%s378_s15 + $0x50] sm:$0xff]  ;;  %v146_v37 = vld [vmem:[%s378_s15 + $0x58] sm:$0xff] }
  0x17   : > { %v216_v31 = vmul.f32 %v143_v25, %v143_v25  ;;  %v217_v35 = vmul.f32 %v144_v29, %v144_v29  ;;  %v218_v39 = vmul.f32 %v145_v33, %v145_v33  ;;  %v147_v41 = vld [vmem:[%s378_s15 + $0x60] sm:$0xff]  ;;  %v219_v43 = vmul.f32 %v146_v37, %v146_v37  ;;  %v148_v45 = vld [vmem:[%s378_s15 + $0x68] sm:$0xff]  ;;  %v149_v49 = vld [vmem:[%s378_s15 + $0x70] sm:$0xff] }
  0x18   : > { %v170_v14 = vadd.f32 %v169_v10, %v138_v4  ;;  %v241_v16 = vadd.f32 %v240_v12, %v210_v8  ;;  %v220_v47 = vmul.f32 %v147_v41, %v147_v41  ;;  %v221_v51 = vmul.f32 %v148_v45, %v148_v45  ;;  %v150_v53 = vld [vmem:[%s378_s15 + $0x78] sm:$0xff]  ;;  %v151_v57 = vld [vmem:[%s378_s15 + $0x80] sm:$0xff]  ;;  %v152_v61 = vld [vmem:[%s378_s15 + $0x88] sm:$0xff] }
  0x19   : > { %v222_v55 = vmul.f32 %v149_v49, %v149_v49  ;;  %v223_v59 = vmul.f32 %v150_v53, %v150_v53  ;;  %v224_v63 = vmul.f32 %v151_v57, %v151_v57  ;;  %v153_v1 = vld [vmem:[%s378_s15 + $0x90] sm:$0xff]  ;;  %v225_v3 = vmul.f32 %v152_v61, %v152_v61  ;;  %v154_v5 = vld [vmem:[%s378_s15 + $0x98] sm:$0xff] }
  0x1a   : > { %v171_v18 = vadd.f32 %v170_v14, %v139_v9  ;;  %v242_v20 = vadd.f32 %v241_v16, %v211_v11  ;;  %v226_v7 = vmul.f32 %v153_v1, %v153_v1  ;;  %v155_v9 = vld [vmem:[%s378_s15 + $0xa0] sm:$0xff]  ;;  %v227_v11 = vmul.f32 %v154_v5, %v154_v5 }
  0x1c   : > { %v172_v22 = vadd.f32 %v171_v18, %v140_v13  ;;  %v243_v24 = vadd.f32 %v242_v20, %v212_v15  ;;  %v156_v13 = vld [vmem:[%s378_s15 + $0xa8] sm:$0xff]  ;;  %v228_v15 = vmul.f32 %v155_v9, %v155_v9 }
  0x1e   : > { %v173_v26 = vadd.f32 %v172_v22, %v141_v17  ;;  %v244_v28 = vadd.f32 %v243_v24, %v213_v19  ;;  %v157_v17 = vld [vmem:[%s378_s15 + $0xb0] sm:$0xff]  ;;  %v229_v19 = vmul.f32 %v156_v13, %v156_v13 }
  0x20   : > { %v174_v30 = vadd.f32 %v173_v26, %v142_v21  ;;  %v245_v32 = vadd.f32 %v244_v28, %v214_v23  ;;  %v158_v21 = vld [vmem:[%s378_s15 + $0xb8] sm:$0xff]  ;;  %v230_v23 = vmul.f32 %v157_v17, %v157_v17 }
  0x22   : > { %v175_v34 = vadd.f32 %v174_v30, %v143_v25  ;;  %v246_v36 = vadd.f32 %v245_v32, %v215_v27  ;;  %v159_v25 = vld [vmem:[%s378_s15 + $0xc0] sm:$0xff]  ;;  %v231_v27 = vmul.f32 %v158_v21, %v158_v21 }
  0x24   : > { %v176_v38 = vadd.f32 %v175_v34, %v144_v29  ;;  %v247_v40 = vadd.f32 %v246_v36, %v216_v31  ;;  %v160_v29 = vld [vmem:[%s378_s15 + $0xc8] sm:$0xff]  ;;  %v232_v31 = vmul.f32 %v159_v25, %v159_v25 }
  0x26   : > { %v177_v42 = vadd.f32 %v176_v38, %v145_v33  ;;  %v248_v44 = vadd.f32 %v247_v40, %v217_v35  ;;  %v161_v33 = vld [vmem:[%s378_s15 + $0xd0] sm:$0xff]  ;;  %v233_v35 = vmul.f32 %v160_v29, %v160_v29 }
  0x28   : > { %v178_v46 = vadd.f32 %v177_v42, %v146_v37  ;;  %v249_v48 = vadd.f32 %v248_v44, %v218_v39  ;;  %v162_v37 = vld [vmem:[%s378_s15 + $0xd8] sm:$0xff]  ;;  %v234_v39 = vmul.f32 %v161_v33, %v161_v33 }
  0x2a   : > { %v179_v50 = vadd.f32 %v178_v46, %v147_v41  ;;  %v250_v52 = vadd.f32 %v249_v48, %v219_v43  ;;  %v163_v41 = vld [vmem:[%s378_s15 + $0xe0] sm:$0xff]  ;;  %v235_v43 = vmul.f32 %v162_v37, %v162_v37 }
  0x2c   : > { %v180_v54 = vadd.f32 %v179_v50, %v148_v45  ;;  %v251_v56 = vadd.f32 %v250_v52, %v220_v47  ;;  %v164_v45 = vld [vmem:[%s378_s15 + $0xe8] sm:$0xff]  ;;  %v236_v47 = vmul.f32 %v163_v41, %v163_v41 }
  0x2e   : > { %v181_v58 = vadd.f32 %v180_v54, %v149_v49  ;;  %v252_v60 = vadd.f32 %v251_v56, %v221_v51  ;;  %v165_v49 = vld [vmem:[%s378_s15 + $0xf0] sm:$0xff]  ;;  %v237_v51 = vmul.f32 %v164_v45, %v164_v45 }
  0x30   : > { %v182_v62 = vadd.f32 %v181_v58, %v150_v53  ;;  %v253_v0 = vadd.f32 %v252_v60, %v222_v55  ;;  %v166_v53 = vld [vmem:[%s378_s15 + $0xf8] sm:$0xff]  ;;  %v238_v55 = vmul.f32 %v165_v49, %v165_v49 }
  0x31   : > { %v239_v58 = vmul.f32 %v166_v53, %v166_v53 }
  0x32   : > { %v183_v2 = vadd.f32 %v182_v62, %v151_v57  ;;  %v254_v4 = vadd.f32 %v253_v0, %v223_v59 }
  0x34   : > { %v184_v6 = vadd.f32 %v183_v2, %v152_v61  ;;  %v255_v8 = vadd.f32 %v254_v4, %v224_v63 }
  0x36   : > { %v185_v10 = vadd.f32 %v184_v6, %v153_v1  ;;  %v256_v12 = vadd.f32 %v255_v8, %v225_v3 }
  0x38   : > { %v186_v14 = vadd.f32 %v185_v10, %v154_v5  ;;  %v257_v16 = vadd.f32 %v256_v12, %v226_v7  ;;  %v167_v7 = vld [vmem:[#allocation2] sm:$0x1]  ;;  %v207_v12 = vld [vmem:[#allocation3] sm:$0x1] }
  0x3a   : > { %v187_v18 = vadd.f32 %v186_v14, %v155_v9  ;;  %v258_v20 = vadd.f32 %v257_v16, %v227_v11 }
  0x3c   : > { %v188_v22 = vadd.f32 %v187_v18, %v156_v13  ;;  %v259_v24 = vadd.f32 %v258_v20, %v228_v15 }
  0x3e   : > { %v189_v26 = vadd.f32 %v188_v22, %v157_v17  ;;  %v260_v28 = vadd.f32 %v259_v24, %v229_v19 }
  0x40   : > { %v190_v30 = vadd.f32 %v189_v26, %v158_v21  ;;  %v261_v32 = vadd.f32 %v260_v28, %v230_v23 }
  0x42   : > { %v191_v34 = vadd.f32 %v190_v30, %v159_v25  ;;  %v262_v36 = vadd.f32 %v261_v32, %v231_v27 }
  0x44   : > { %v192_v38 = vadd.f32 %v191_v34, %v160_v29  ;;  %v263_v40 = vadd.f32 %v262_v36, %v232_v31 }
  0x46   : > { %v193_v42 = vadd.f32 %v192_v38, %v161_v33  ;;  %v264_v44 = vadd.f32 %v263_v40, %v233_v35 }
  0x48   : > { %v194_v46 = vadd.f32 %v193_v42, %v162_v37  ;;  %v265_v48 = vadd.f32 %v264_v44, %v234_v39 }
  0x4a   : > { %v195_v50 = vadd.f32 %v194_v46, %v163_v41  ;;  %v266_v52 = vadd.f32 %v265_v48, %v235_v43 }
  0x4c   : > { %v196_v54 = vadd.f32 %v195_v50, %v164_v45  ;;  %v267_v56 = vadd.f32 %v266_v52, %v236_v47 }
  0x4e   : > { %v197_v57 = vadd.f32 %v196_v54, %v165_v49  ;;  %v268_v59 = vadd.f32 %v267_v56, %v237_v51 }
  0x50   : > { %v198_v60 = vadd.f32 %v197_v57, %v166_v53  ;;  %v269_v61 = vadd.f32 %v268_v59, %v238_v55 }
  0x52   : > { %v199_v62 = vrot.slane %v198_v60, 4  ;;  %v270_v63 = vadd.f32 %v269_v61, %v239_v58 }
  0x54   : > { %v200_v0 = vadd.f32 %v199_v62, %v198_v60  ;;  %v271_v1 = vrot.slane %v270_v63, 4 }
  0x56   : > { %v201_v2 = vrot.slane %v200_v0, 2  ;;  %v272_v3 = vadd.f32 %v271_v1, %v270_v63 }
  0x58   : > { %v202_v4 = vadd.f32 %v201_v2, %v200_v0  ;;  %v273_v5 = vrot.slane %v272_v3, 2 }
  0x5a   : > { %v203_v6 = vrot.slane %v202_v4, 1  ;;  %v274_v8 = vadd.f32 %v273_v5, %v272_v3 }
  0x5c   : > { %v204_v9 = vadd.f32 %v203_v6, %v202_v4  ;;  %v275_v10 = vrot.slane %v274_v8, 1 }
  0x5e   : > { %v205_v11 = vadd.f32 %v204_v9, %v167_v7  ;;  %v276_v13 = vadd.f32 %v275_v10, %v274_v8  ;;  %282 = sbr.rel (%p328_p5) target bundleno = 107 (0x6b), region = 32 }
  0x60   : > { %206 = vst [vmem:[#allocation2] sm:$0x1] %v205_v11  ;;  %v277_v14 = vadd.f32 %v276_v13, %v207_v12 }
  0x62   : > { %278 = vst [vmem:[#allocation3] sm:$0x1] %v277_v14 }
  0x67   : > { %v283_v15 = vld [vmem:[#allocation2] sm:$0x1] }
  0x68   : > { %284 = vst [vmem:[%s424_s1] sm:$0x1] %v283_v15 }
  0x69   : > { %v285_v16 = vld [vmem:[#allocation3] sm:$0x1] }
  0x6a   : > { %286 = vst [vmem:[%s425_s2] sm:$0x1] %v285_v16 }
  0x6b PF: > { %s13_s9 = sadd.s32 1, %s346_s9  }
  0x6c   : > { %p10_p6 = scmp.ge.s32.totalorder %s13_s9, 4  }
  0x6e   :  { %12 = sbr.rel (!%p10_p6) target bundleno = 1 (0x1), region = 66 }

// kernel: unet_block_innermost.7
= control target key start
LH: loop header
LB: loop body
LE: loop exit
PB: predicated region body
PF: predicated region fallthrough
CT: control target
= control target key end

     0   :  { %s415_s12 = smov 0   ;;  %s574_s0 = inlined_call_operand.vmem [shape: f32[512,128], index: 0, kind: input, shape index: {}]   ;;  %s575_s1 = inlined_call_operand.vmem [shape: f32[1,128], index: 1, kind: input, shape index: {}]   ;;  %s576_s2 = inlined_call_operand.vmem [shape: f32[1,128], index: 2, kind: input, shape index: {}]   ;;  %s577_s3 = inlined_call_operand.vmem [shape: f32[512,128], index: 3, kind: output, shape index: {}]  }
   0x1 LB: > { %s366_s13 = sadd.s32 4294967295, %s393_s12   ;;  %p370_p0 = scmp.ge.s32.totalorder %s393_s12, 1  ;;  %s393_s12 = sphi %s415_s12, %s13_s12  }
   0x2   : > { %p138_p1 = scmp.lt.s32.totalorder %s393_s12, 3 }
   0x4   : > { %p139_p2 = pnand %p370_p0, %p138_p1 }
   0x5   : > { %s371_s14 = sshll.u32 (!%p139_p2), %s366_s13, 5 }
   0x6   : > { %142 = sbr.rel (%p139_p2) target bundleno = 51 (0x33), region = 32  ;;  %p163_p3 = scmp.lt.s32.totalorder (!%p139_p2), %s371_s14, 63 }
   0xb   : > { %s579_s14 = smov (!%p163_p3, %s371_s14), 63  ;;  %v426_v0 = vld [vmem:[%s575_s1] ss:$0 sm:$0xff] }
   0xc   : > { %s372_s17 = sshll.u32 %s579_s14, 3  ;;  %v436_v1 = vld [vmem:[%s576_s2] ss:$0 sm:$0xff] }
   0xd   : > { %s431_s20 = scalar_lea.vmem %s574_s0, %s372_s17  ;;  %s450_s25 = scalar_lea.vmem %s577_s3, %s372_s17 }
   0xe   : > { %v174_v2 = vld [vmem:[%s431_s20] sm:$0xff]  ;;  %v175_v3 = vld [vmem:[%s431_s20 + $0x8] sm:$0xff]  ;;  %v176_v4 = vld [vmem:[%s431_s20 + $0x10] sm:$0xff] }
   0xf   : > { %v210_v5 = vmul.f32 %v426_v0, %v174_v2  ;;  %v211_v6 = vmul.f32 %v426_v0, %v175_v3  ;;  %v212_v7 = vmul.f32 %v426_v0, %v176_v4  ;;  %v177_v8 = vld [vmem:[%s431_s20 + $0x18] sm:$0xff]  ;;  %v178_v9 = vld [vmem:[%s431_s20 + $0x20] sm:$0xff]  ;;  %v179_v10 = vld [vmem:[%s431_s20 + $0x28] sm:$0xff] }
  0x10   : > { %v213_v11 = vmul.f32 %v426_v0, %v177_v8  ;;  %v214_v12 = vmul.f32 %v426_v0, %v178_v9  ;;  %v215_v13 = vmul.f32 %v426_v0, %v179_v10  ;;  %v180_v14 = vld [vmem:[%s431_s20 + $0x30] sm:$0xff]  ;;  %v181_v15 = vld [vmem:[%s431_s20 + $0x38] sm:$0xff]  ;;  %v182_v16 = vld [vmem:[%s431_s20 + $0x40] sm:$0xff] }
  0x11   : > { %v246_v17 = vadd.f32 %v436_v1, %v210_v5  ;;  %v247_v18 = vadd.f32 %v436_v1, %v211_v6  ;;  %v248_v19 = vadd.f32 %v436_v1, %v212_v7  ;;  %v216_v20 = vmul.f32 %v426_v0, %v180_v14  ;;  %v183_v21 = vld [vmem:[%s431_s20 + $0x48] sm:$0xff]  ;;  %v184_v24 = vld [vmem:[%s431_s20 + $0x50] sm:$0xff]  ;;  %v185_v27 = vld [vmem:[%s431_s20 + $0x58] sm:$0xff] }
  0x12   : > { %v249_v22 = vadd.f32 %v436_v1, %v213_v11  ;;  %v217_v23 = vmul.f32 %v426_v0, %v181_v15  ;;  %v250_v25 = vadd.f32 %v436_v1, %v214_v12  ;;  %v218_v26 = vmul.f32 %v426_v0, %v182_v16  ;;  %v186_v30 = vld [vmem:[%s431_s20 + $0x60] sm:$0xff]  ;;  %v187_v33 = vld [vmem:[%s431_s20 + $0x68] sm:$0xff]  ;;  %v188_v36 = vld [vmem:[%s431_s20 + $0x70] sm:$0xff] }
  0x13   : > { %278 = vst [vmem:[%s450_s25] sm:$0xff] %v246_v17  ;;  %v251_v28 = vadd.f32 %v436_v1, %v215_v13  ;;  %v219_v29 = vmul.f32 %v426_v0, %v183_v21  ;;  %v252_v31 = vadd.f32 %v436_v1, %v216_v20  ;;  %v220_v32 = vmul.f32 %v426_v0, %v184_v24  ;;  %v189_v39 = vld [vmem:[%s431_s20 + $0x78] sm:$0xff]  ;;  %v190_v42 = vld [vmem:[%s431_s20 + $0x80] sm:$0xff]  ;;  %v191_v45 = vld [vmem:[%s431_s20 + $0x88] sm:$0xff] }
  0x14   : > { %279 = vst [vmem:[%s450_s25 + $0x8] sm:$0xff] %v247_v18  ;;  %v253_v34 = vadd.f32 %v436_v1, %v217_v23  ;;  %v221_v35 = vmul.f32 %v426_v0, %v185_v27  ;;  %v254_v37 = vadd.f32 %v436_v1, %v218_v26  ;;  %v222_v38 = vmul.f32 %v426_v0, %v186_v30  ;;  %v192_v48 = vld [vmem:[%s431_s20 + $0x90] sm:$0xff]  ;;  %v193_v51 = vld [vmem:[%s431_s20 + $0x98] sm:$0xff]  ;;  %v194_v54 = vld [vmem:[%s431_s20 + $0xa0] sm:$0xff] }
  0x15   : > { %280 = vst [vmem:[%s450_s25 + $0x10] sm:$0xff] %v248_v19  ;;  %v255_v40 = vadd.f32 %v436_v1, %v219_v29  ;;  %v223_v41 = vmul.f32 %v426_v0, %v187_v33  ;;  %v256_v43 = vadd.f32 %v436_v1, %v220_v32  ;;  %v224_v44 = vmul.f32 %v426_v0, %v188_v36  ;;  %v195_v57 = vld [vmem:[%s431_s20 + $0xa8] sm:$0xff]  ;;  %v196_v60 = vld [vmem:[%s431_s20 + $0xb0] sm:$0xff]  ;;  %v197_v63 = vld [vmem:[%s431_s20 + $0xb8] sm:$0xff] }
  0x16   : > { %281 = vst [vmem:[%s450_s25 + $0x18] sm:$0xff] %v249_v22  ;;  %v257_v46 = vadd.f32 %v436_v1, %v221_v35  ;;  %v225_v47 = vmul.f32 %v426_v0, %v189_v39  ;;  %v258_v49 = vadd.f32 %v436_v1, %v222_v38  ;;  %v226_v50 = vmul.f32 %v426_v0, %v190_v42  ;;  %v198_v4 = vld [vmem:[%s431_s20 + $0xc0] sm:$0xff]  ;;  %v199_v7 = vld [vmem:[%s431_s20 + $0xc8] sm:$0xff]  ;;  %v200_v10 = vld [vmem:[%s431_s20 + $0xd0] sm:$0xff] }
  0x17   : > { %282 = vst [vmem:[%s450_s25 + $0x20] sm:$0xff] %v250_v25  ;;  %v259_v52 = vadd.f32 %v436_v1, %v223_v41  ;;  %v227_v53 = vmul.f32 %v426_v0, %v191_v45  ;;  %v260_v55 = vadd.f32 %v436_v1, %v224_v44  ;;  %v228_v56 = vmul.f32 %v426_v0, %v192_v48  ;;  %v201_v13 = vld [vmem:[%s431_s20 + $0xd8] sm:$0xff]  ;;  %v202_v16 = vld [vmem:[%s431_s20 + $0xe0] sm:$0xff]  ;;  %v203_v19 = vld [vmem:[%s431_s20 + $0xe8] sm:$0xff] }
  0x18   : > { %283 = vst [vmem:[%s450_s25 + $0x28] sm:$0xff] %v251_v28  ;;  %v261_v58 = vadd.f32 %v436_v1, %v225_v47  ;;  %v229_v59 = vmul.f32 %v426_v0, %v193_v51  ;;  %v262_v61 = vadd.f32 %v436_v1, %v226_v50  ;;  %v230_v62 = vmul.f32 %v426_v0, %v194_v54  ;;  %v204_v22 = vld [vmem:[%s431_s20 + $0xf0] sm:$0xff]  ;;  %v205_v25 = vld [vmem:[%s431_s20 + $0xf8] sm:$0xff] }
  0x19   : > { %284 = vst [vmem:[%s450_s25 + $0x30] sm:$0xff] %v252_v31  ;;  %v263_v2 = vadd.f32 %v436_v1, %v227_v53  ;;  %v231_v3 = vmul.f32 %v426_v0, %v195_v57  ;;  %v264_v5 = vadd.f32 %v436_v1, %v228_v56  ;;  %v232_v6 = vmul.f32 %v426_v0, %v196_v60 }
  0x1a   : > { %285 = vst [vmem:[%s450_s25 + $0x38] sm:$0xff] %v253_v34  ;;  %v265_v8 = vadd.f32 %v436_v1, %v229_v59  ;;  %v233_v9 = vmul.f32 %v426_v0, %v197_v63  ;;  %v266_v11 = vadd.f32 %v436_v1, %v230_v62  ;;  %v234_v12 = vmul.f32 %v426_v0, %v198_v4 }
  0x1b   : > { %286 = vst [vmem:[%s450_s25 + $0x40] sm:$0xff] %v254_v37  ;;  %v267_v14 = vadd.f32 %v436_v1, %v231_v3  ;;  %v235_v15 = vmul.f32 %v426_v0, %v199_v7  ;;  %v268_v17 = vadd.f32 %v436_v1, %v232_v6  ;;  %v236_v18 = vmul.f32 %v426_v0, %v200_v10 }
  0x1c   : > { %287 = vst [vmem:[%s450_s25 + $0x48] sm:$0xff] %v255_v40  ;;  %v269_v20 = vadd.f32 %v436_v1, %v233_v9  ;;  %v237_v21 = vmul.f32 %v426_v0, %v201_v13  ;;  %v270_v23 = vadd.f32 %v436_v1, %v234_v12  ;;  %v238_v24 = vmul.f32 %v426_v0, %v202_v16 }
  0x1d   : > { %288 = vst [vmem:[%s450_s25 + $0x50] sm:$0xff] %v256_v43  ;;  %v271_v26 = vadd.f32 %v436_v1, %v235_v15  ;;  %v239_v27 = vmul.f32 %v426_v0, %v203_v19  ;;  %v272_v28 = vadd.f32 %v436_v1, %v236_v18  ;;  %v240_v29 = vmul.f32 %v426_v0, %v204_v22 }
  0x1e   : > { %289 = vst [vmem:[%s450_s25 + $0x58] sm:$0xff] %v257_v46  ;;  %v273_v30 = vadd.f32 %v436_v1, %v237_v21  ;;  %v241_v31 = vmul.f32 %v426_v0, %v205_v25  ;;  %v274_v32 = vadd.f32 %v436_v1, %v238_v24 }
  0x1f   : > { %290 = vst [vmem:[%s450_s25 + $0x60] sm:$0xff] %v258_v49  ;;  %v275_v33 = vadd.f32 %v436_v1, %v239_v27  ;;  %v276_v34 = vadd.f32 %v436_v1, %v240_v29 }
  0x20   : > { %291 = vst [vmem:[%s450_s25 + $0x68] sm:$0xff] %v259_v52  ;;  %v277_v35 = vadd.f32 %v436_v1, %v241_v31 }
  0x21   : > { %292 = vst [vmem:[%s450_s25 + $0x70] sm:$0xff] %v260_v55 }
  0x22   : > { %293 = vst [vmem:[%s450_s25 + $0x78] sm:$0xff] %v261_v58 }
  0x23   : > { %294 = vst [vmem:[%s450_s25 + $0x80] sm:$0xff] %v262_v61 }
  0x24   : > { %295 = vst [vmem:[%s450_s25 + $0x88] sm:$0xff] %v263_v2 }
  0x25   : > { %296 = vst [vmem:[%s450_s25 + $0x90] sm:$0xff] %v264_v5 }
  0x26   : > { %297 = vst [vmem:[%s450_s25 + $0x98] sm:$0xff] %v265_v8 }
  0x27   : > { %298 = vst [vmem:[%s450_s25 + $0xa0] sm:$0xff] %v266_v11 }
  0x28   : > { %299 = vst [vmem:[%s450_s25 + $0xa8] sm:$0xff] %v267_v14 }
  0x29   : > { %300 = vst [vmem:[%s450_s25 + $0xb0] sm:$0xff] %v268_v17 }
  0x2a   : > { %301 = vst [vmem:[%s450_s25 + $0xb8] sm:$0xff] %v269_v20 }
  0x2b   : > { %302 = vst [vmem:[%s450_s25 + $0xc0] sm:$0xff] %v270_v23 }
  0x2c   : > { %303 = vst [vmem:[%s450_s25 + $0xc8] sm:$0xff] %v271_v26 }
  0x2d   : > { %304 = vst [vmem:[%s450_s25 + $0xd0] sm:$0xff] %v272_v28 }
  0x2e   : > { %305 = vst [vmem:[%s450_s25 + $0xd8] sm:$0xff] %v273_v30 }
  0x2f   : > { %306 = vst [vmem:[%s450_s25 + $0xe0] sm:$0xff] %v274_v32 }
  0x30   : > { %307 = vst [vmem:[%s450_s25 + $0xe8] sm:$0xff] %v275_v33 }
  0x31   : > { %308 = vst [vmem:[%s450_s25 + $0xf0] sm:$0xff] %v276_v34 }
  0x32   : > { %309 = vst [vmem:[%s450_s25 + $0xf8] sm:$0xff] %v277_v35 }
  0x33 PF: > { %s13_s12 = sadd.s32 1, %s393_s12  }
  0x34   : > { %p10_p4 = scmp.ge.s32.totalorder %s13_s12, 4  }
  0x36   :  { %12 = sbr.rel (!%p10_p4) target bundleno = 1 (0x1), region = 62 }

// kernel: unet_block_innermost.5
= control target key start
LH: loop header
LB: loop body
LE: loop exit
PB: predicated region body
PF: predicated region fallthrough
CT: control target
= control target key end

     0   :  { %s853_s9 = smov 0   ;;  %s855_s10 = smov 0   ;;  %s925_s0 = inlined_call_operand.vmem [shape: bf16[4,128,128], index: 0, kind: input, shape index: {}]   ;;  %s926_s1 = inlined_call_operand.vmem [shape: bf16[4,128,128], index: 1, kind: input, shape index: {}]   ;;  %s927_s2 = inlined_call_operand.vmem [shape: f32[4,128,128], index: 2, kind: output, shape index: {}]  }
   0x1   :  { %s857_s11 = smov 0  }
   0x2 LB: > { %s38_s12 = sadd.s32 1, %s832_s10  ;;  %p674_p0 = scmp.ge.s32.totalorder %s836_s11, 1  ;;  %s836_s11 = sphi %s857_s11, %s12_s11   ;;  %s832_s10 = sphi %s855_s10, %s929_s10   ;;  %s828_s9 = sphi %s853_s9, %s928_s9  }
   0x3   : > { %p40_p1 = scmp.ge.s32.totalorder %s38_s12, 4  ;;  %p176_p2 = scmp.lt.s32.totalorder %s836_s11, 5 }
   0x5   : > { %s931_s12 = smov (%p40_p1, %s38_s12), 0  ;;  %p177_p3 = pnand %p674_p0, %p176_p2 }
   0x6   : > { %p225_p4 = scmp.lt.s32.totalorder (!%p177_p3), %s828_s9, 3 }
   0x7   : > { %180 = sbr.rel (%p177_p3) target bundleno = 206 (0xce), region = 28 }
   0xc   : > { %s933_s9 = smov (!%p225_p4, %s828_s9), 3 }
   0xd   : > { %s747_s13 = sshll.u32 %s933_s9, 6  ;;  %s749_s20 = sshll.u32 %s933_s9, 7 }
   0xe   : > { %s879_s16 = scalar_lea.vmem %s926_s1, %s747_s13  ;;  %s235_s19 = scalar_lea.vmem %s925_s0, %s747_s13 }
   0xf   : > { %v765_v0 = vld [vmem:[%s879_s16 + $0x38] sm:$0xff]  ;;  %v764_v1 = vld [vmem:[%s879_s16 + $0x30] sm:$0xff]  ;;  %v763_v2 = vld [vmem:[%s879_s16 + $0x28] sm:$0xff]  ;;  %s898_s23 = scalar_lea.vmem %s927_s2, %s749_s20 }
  0x10   : > { %427 = vmatpush.bf16.msra.mxu0 %v765_v0  ;;  %766 = vmatpush.bf16.msra.mxu1 %v765_v0  ;;  %v762_v3 = vld [vmem:[%s879_s16 + $0x20] sm:$0xff]  ;;  %v761_v4 = vld [vmem:[%s879_s16 + $0x18] sm:$0xff]  ;;  %v760_v5 = vld [vmem:[%s879_s16 + $0x10] sm:$0xff] }
  0x11   : > { %767 = vmatpush.bf16.msra.mxu2 %v765_v0  ;;  %768 = vmatpush.bf16.msra.mxu3 %v765_v0  ;;  %v759_v6 = vld [vmem:[%s879_s16 + $0x8] sm:$0xff]  ;;  %v758_v7 = vld [vmem:[%s879_s16] sm:$0xff]  ;;  %v752_v9 = vld [vmem:[%s235_s19 + $0x10] sm:$0xff] }
  0x12   : > { %v750_v8 = vld [vmem:[%s235_s19] sm:$0xff]  ;;  %v756_v11 = vld [vmem:[%s235_s19 + $0x30] sm:$0xff]  ;;  %v751_v12 = vld [vmem:[%s235_s19 + $0x8] sm:$0xff] }
  0x13   : > { %v754_v10 = vld [vmem:[%s235_s19 + $0x20] sm:$0xff]  ;;  %v753_v13 = vld [vmem:[%s235_s19 + $0x18] sm:$0xff]  ;;  %v755_v14 = vld [vmem:[%s235_s19 + $0x28] sm:$0xff] }
  0x14   : > { %428 = vmatpush.bf16.msra.mxu0 %v764_v1  ;;  %769 = vmatpush.bf16.msra.mxu1 %v764_v1  ;;  %v757_v15 = vld [vmem:[%s235_s19 + $0x38] sm:$0xff] }
  0x15   : > { %770 = vmatpush.bf16.msra.mxu2 %v764_v1  ;;  %771 = vmatpush.bf16.msra.mxu3 %v764_v1 }
  0x18   : > { %429 = vmatpush.bf16.msra.mxu0 %v763_v2  ;;  %772 = vmatpush.bf16.msra.mxu1 %v763_v2 }
  0x19   : > { %773 = vmatpush.bf16.msra.mxu2 %v763_v2  ;;  %774 = vmatpush.bf16.msra.mxu3 %v763_v2 }
  0x1c   : > { %430 = vmatpush.bf16.msra.mxu0 %v762_v3  ;;  %775 = vmatpush.bf16.msra.mxu1 %v762_v3 }
  0x1d   : > { %776 = vmatpush.bf16.msra.mxu2 %v762_v3  ;;  %777 = vmatpush.bf16.msra.mxu3 %v762_v3 }
  0x20   : > { %431 = vmatpush.bf16.msra.mxu0 %v761_v4  ;;  %778 = vmatpush.bf16.msra.mxu1 %v761_v4 }
  0x21   : > { %779 = vmatpush.bf16.msra.mxu2 %v761_v4  ;;  %780 = vmatpush.bf16.msra.mxu3 %v761_v4 }
  0x24   : > { %432 = vmatpush.bf16.msra.mxu0 %v760_v5  ;;  %781 = vmatpush.bf16.msra.mxu1 %v760_v5 }
  0x25   : > { %782 = vmatpush.bf16.msra.mxu2 %v760_v5  ;;  %783 = vmatpush.bf16.msra.mxu3 %v760_v5 }
  0x28   : > { %433 = vmatpush.bf16.msra.mxu0 %v759_v6  ;;  %784 = vmatpush.bf16.msra.mxu1 %v759_v6 }
  0x29   : > { %785 = vmatpush.bf16.msra.mxu2 %v759_v6  ;;  %786 = vmatpush.bf16.msra.mxu3 %v759_v6 }
  0x2c   : > { %434 = vmatpush.bf16.msra.mxu0 %v758_v7  ;;  %787 = vmatpush.bf16.msra.mxu1 %v758_v7 }
  0x2d   : > { %788 = vmatpush.bf16.msra.mxu2 %v758_v7  ;;  %789 = vmatpush.bf16.msra.mxu3 %v758_v7 }
  0x2f   : > { %435 = vmatmul.bf16.vlgmr.msra.gmra.mxu0 %v750_v8  ;;  %445 = vmatmul.bf16.vlgmr.msra.gmra.mxu1 %v752_v9 }
  0x30   : > { %455 = vmatmul.bf16.vlgmr.msra.gmra.mxu2 %v754_v10  ;;  %465 = vmatmul.bf16.vlgmr.msra.gmra.mxu3 %v756_v11 }
  0x3f   : > { %440 = vmatmul.bf16.gmra.mxu0 %v751_v12  ;;  %450 = vmatmul.bf16.gmra.mxu1 %v753_v13 }
  0x40   : > { %460 = vmatmul.bf16.gmra.mxu2 %v755_v14  ;;  %470 = vmatmul.bf16.gmra.mxu3 %v757_v15 }
  0xac   : > { %v436_v16 = vpop.f32.mrf.mxu0  ;;  %v446_v17 = vpop.f32.mrf.mxu1 }
  0xad   : > { %527 = vst [vmem:[%s898_s23] sm:$0xff] %v436_v16 }
  0xae   : > { %531 = vst [vmem:[%s898_s23 + $0x20] sm:$0xff] %v446_v17 }
  0xb3   : > { %v456_v18 = vpop.f32.mrf.mxu2  ;;  %v466_v19 = vpop.f32.mrf.mxu3 }
  0xb4   : > { %535 = vst [vmem:[%s898_s23 + $0x40] sm:$0xff] %v456_v18  ;;  %v438_v20 = vpop.f32.mrf.mxu0  ;;  %v448_v21 = vpop.f32.mrf.mxu1 }
  0xb5   : > { %539 = vst [vmem:[%s898_s23 + $0x60] sm:$0xff] %v466_v19 }
  0xb6   : > { %528 = vst [vmem:[%s898_s23 + $0x8] sm:$0xff] %v438_v20 }
  0xb7   : > { %532 = vst [vmem:[%s898_s23 + $0x28] sm:$0xff] %v448_v21 }
  0xbb   : > { %v458_v22 = vpop.f32.mrf.mxu2  ;;  %v468_v23 = vpop.f32.mrf.mxu3 }
  0xbc   : > { %536 = vst [vmem:[%s898_s23 + $0x48] sm:$0xff] %v458_v22  ;;  %v441_v24 = vpop.f32.mrf.mxu0  ;;  %v451_v25 = vpop.f32.mrf.mxu1 }
  0xbd   : > { %540 = vst [vmem:[%s898_s23 + $0x68] sm:$0xff] %v468_v23 }
  0xbe   : > { %529 = vst [vmem:[%s898_s23 + $0x10] sm:$0xff] %v441_v24 }
  0xbf   : > { %533 = vst [vmem:[%s898_s23 + $0x30] sm:$0xff] %v451_v25 }
  0xc3   : > { %v461_v26 = vpop.f32.mrf.mxu2  ;;  %v471_v27 = vpop.f32.mrf.mxu3 }
  0xc4   : > { %537 = vst [vmem:[%s898_s23 + $0x50] sm:$0xff] %v461_v26  ;;  %v443_v28 = vpop.f32.mrf.mxu0  ;;  %v453_v29 = vpop.f32.mrf.mxu1 }
  0xc5   : > { %541 = vst [vmem:[%s898_s23 + $0x70] sm:$0xff] %v471_v27 }
  0xc6   : > { %530 = vst [vmem:[%s898_s23 + $0x18] sm:$0xff] %v443_v28 }
  0xc7   : > { %534 = vst [vmem:[%s898_s23 + $0x38] sm:$0xff] %v453_v29 }
  0xcb   : > { %v463_v30 = vpop.f32.mrf.mxu2  ;;  %v473_v31 = vpop.f32.mrf.mxu3 }
  0xcc   : > { %538 = vst [vmem:[%s898_s23 + $0x58] sm:$0xff] %v463_v30 }
  0xcd   : > { %542 = vst [vmem:[%s898_s23 + $0x78] sm:$0xff] %v473_v31 }
  0xce PF: > { %s12_s11 = sadd.s32 1, %s836_s11   ;;  %s928_s9 = smov %s832_s10 }
  0xcf   : > { %p9_p5 = scmp.ge.s32.totalorder %s12_s11, 6   ;;  %s929_s10 = smov %s931_s12 }
  0xd1   :  { %11 = sbr.rel (!%p9_p5) target bundleno = 2 (0x2), region = 69 }

</bundles_post_ra>
